<compile_context>
chip_gen: v7x
topology: tpu7x:2x2x1
jax: 0.10.0
libtpu: 0.0.40
codegen_flags: <defaults>
</compile_context>

<pallas_src>
import functools

import jax
import jax.numpy as jnp
from jax.experimental import pallas as pl
from jax.experimental.pallas import tpu as pltpu

C_IN = 256  # fixed by the module: nn.Conv1d(256, 1, 1)


def _dhead_kernel(b_ref, x_ref, w_ref, o_ref):
    # x_ref: (bn, C_IN) VMEM tile; w_ref: (C_IN, 1) VMEM; b_ref: (1, 1) SMEM.
    # Single MXU matvec per tile + bias + sigmoid (EUP); all hidden under the
    # 1 MiB/step input DMA.
    acc = jnp.dot(x_ref[...], w_ref[...], preferred_element_type=jnp.float32)
    o_ref[...] = jax.nn.sigmoid(acc + b_ref[0, 0]).astype(o_ref.dtype)


@functools.partial(jax.jit, static_argnames=("block_n",))
def dhead_forward(x, weight, bias, *, block_n=1024):
    """DHead forward.

    x:      (N, C_IN) float32
    weight: (1, C_IN, 1) float32  (PyTorch Conv1d(256, 1, 1) weight layout)
    bias:   (1,) float32
    returns (N, 1, 1) float32, matching the PyTorch module.
    """
    n, c = x.shape
    assert c == C_IN, f"expected {C_IN} channels, got {c}"

    # Conv1d(256, 1, 1) weight (1, 256, 1) is just 256 contiguous floats ->
    # view as a (C_IN, 1) matvec weight (free reshape, no data movement).
    w = weight.reshape(C_IN, 1).astype(jnp.float32)
    bias2d = bias.reshape(1, 1).astype(jnp.float32)

    # Clamp the tile to the batch for tiny inputs (a full-extent block dim is
    # always legal); large batches get 1024-row tiles and a cdiv grid with a
    # partial tail block (OOB output rows are dropped by Pallas).
    bn = min(block_n, n)
    grid_n = pl.cdiv(n, bn)

    cost = pl.CostEstimate(
        flops=2 * n * C_IN,
        transcendentals=n,                                  # one sigmoid per row
        bytes_accessed=n * C_IN * 4 + n * 4 + C_IN * 4 + 4,  # x + out + w + b
    )

    out = pl.pallas_call(
        _dhead_kernel,
        out_shape=jax.ShapeDtypeStruct((n, 1), jnp.float32),
        grid_spec=pltpu.PrefetchScalarGridSpec(
            num_scalar_prefetch=0,
            grid=(grid_n,),
            in_specs=[
                pl.BlockSpec(memory_space=pltpu.SMEM),            # bias (1, 1)
                pl.BlockSpec((bn, C_IN), lambda i: (i, 0)),       # x tile
                pl.BlockSpec((C_IN, 1), lambda i: (0, 0)),        # weight (resident)
            ],
            out_specs=pl.BlockSpec((bn, 1), lambda i: (i, 0)),
        ),
        compiler_params=pltpu.CompilerParams(
            dimension_semantics=("parallel",)),                   # megacore on v7x
        cost_estimate=cost,
    )(bias2d, x, w)

    # Match PyTorch output shape (N, 1, 1).
    return out.reshape(n, 1, 1)


def dhead_reference(x, weight, bias):
    w = weight.reshape(C_IN, 1)
    return jax.nn.sigmoid(x @ w + bias[None, :]).reshape(x.shape[0], 1, 1)


if __name__ == "__main__":
    key = jax.random.PRNGKey(0)
    kx1, kx2, kw, kb = jax.random.split(key, 4)

    # Deterministic Conv1d(256, 1, 1) parameters in their PyTorch layout.
    weight = (jax.random.normal(kw, (1, C_IN, 1), dtype=jnp.float32)
              * (1.0 / jnp.sqrt(C_IN)))
    bias = jax.random.normal(kb, (1,), dtype=jnp.float32) * 0.1

    # Case 1: small batch, default (large) block_n -> clamped to a single block.
    x1 = jax.random.normal(kx1, (16, C_IN), dtype=jnp.float32)
    out1 = dhead_forward(x1, weight, bias)
    jax.block_until_ready(out1)
    ref1 = dhead_reference(x1, weight, bias)
    assert out1.shape == (16, 1, 1), out1.shape
    assert jnp.allclose(out1, ref1, atol=1e-5, rtol=1e-5), "case 1 mismatch"

    # Case 2: batch (20) not divisible by the block (8) -> exercises the
    # cdiv grid / partial tail-block path used at large block_n.
    x2 = jax.random.normal(kx2, (20, C_IN), dtype=jnp.float32)
    out2 = dhead_forward(x2, weight, bias, block_n=8)
    jax.block_until_ready(out2)
    ref2 = dhead_reference(x2, weight, bias)
    assert out2.shape == (20, 1, 1), out2.shape
    assert jnp.allclose(out2, ref2, atol=1e-5, rtol=1e-5), "case 2 mismatch"

    print("KERNEL_OK")
</pallas_src>

<mosaic_0001>
module attributes {stable_mosaic.version = 11 : i64} {
  func.func @_dhead_kernel(%arg0: i32, %arg1: memref<1x1xf32, #tpu.memory_space<smem>>, %arg2: memref<16x256xf32, #tpu.memory_space<vmem>>, %arg3: memref<256x1xf32, #tpu.memory_space<vmem>>, %arg4: memref<16x1xf32, #tpu.memory_space<vmem>>) attributes {dimension_semantics = [#tpu.dimension_semantics<parallel>], iteration_bounds = array<i64: 1>, scalar_prefetch = 0 : i64, scratch_operands = 0 : i64, tpu.core_type = #tpu.core_type<tc>, window_params = [{transform_indices = @transform_0, window_bounds = array<i64: 1, 1>}, {transform_indices = @transform_1, window_bounds = array<i64: 16, 256>}, {pipeline_mode = #tpu.pipeline_mode<synchronous>, transform_indices = @transform_2, window_bounds = array<i64: 256, 1>}, {transform_indices = @transform_3, window_bounds = array<i64: 16, 1>}]} {
    %c0 = arith.constant 0 : index
    %c0_0 = arith.constant 0 : index
    %0 = vector.load %arg2[%c0, %c0_0] : memref<16x256xf32, #tpu.memory_space<vmem>>, vector<16x256xf32>
    %c0_1 = arith.constant 0 : index
    %c0_2 = arith.constant 0 : index
    %1 = vector.load %arg3[%c0_1, %c0_2] : memref<256x1xf32, #tpu.memory_space<vmem>>, vector<256x1xf32>
    %cst = arith.constant dense<0.000000e+00> : vector<16x1xf32>
    %2 = tpu.matmul %0, %1, %cst {dimension_numbers = #tpu.dot_dimension_numbers<[1], [0], [0], [1], [0, 0, 1, 1], [], []>} : vector<16x256xf32>, vector<256x1xf32>, vector<16x1xf32> -> vector<16x1xf32>
    %c0_3 = arith.constant 0 : index
    %c0_4 = arith.constant 0 : index
    %3 = memref.load %arg1[%c0_3, %c0_4] : memref<1x1xf32, #tpu.memory_space<smem>>
    %4 = vector.broadcast %3 : f32 to vector<16x1xf32>
    %5 = arith.addf %2, %4 : vector<16x1xf32>
    %6 = arith.negf %5 : vector<16x1xf32>
    %7 = math.exp %6 : vector<16x1xf32>
    %cst_5 = arith.constant 1.000000e+00 : f32
    %8 = vector.broadcast %cst_5 : f32 to vector<16x1xf32>
    %9 = arith.addf %8, %7 : vector<16x1xf32>
    %10 = arith.divf %8, %9 : vector<16x1xf32>
    %c0_6 = arith.constant 0 : index
    %c0_7 = arith.constant 0 : index
    %11 = vector.load %arg4[%c0_6, %c0_7] : memref<16x1xf32, #tpu.memory_space<vmem>>, vector<16x1xf32>
    tpu.vector_store %arg4[%c0_6, %c0_7], %10 {strides = array<i32>} : memref<16x1xf32, #tpu.memory_space<vmem>>, vector<16x1xf32>,
    return
  }
  func.func @transform_0(%arg0: i32) -> (i32, i32) {
    %c0_i32 = arith.constant 0 : i32
    %c0_i32_0 = arith.constant 0 : i32
    %c0_i32_1 = arith.constant 0 : i32
    return %c0_i32, %c0_i32_0 : i32, i32
  }
  func.func @transform_1(%arg0: i32) -> (i32, i32) {
    %c0_i32 = arith.constant 0 : i32
    %c0_i32_0 = arith.constant 0 : i32
    return %arg0, %c0_i32 : i32, i32
  }
  func.func @transform_2(%arg0: i32) -> (i32, i32) {
    %c0_i32 = arith.constant 0 : i32
    %c0_i32_0 = arith.constant 0 : i32
    %c0_i32_1 = arith.constant 0 : i32
    return %c0_i32, %c0_i32_0 : i32, i32
  }
  func.func @transform_3(%arg0: i32) -> (i32, i32) {
    %c0_i32 = arith.constant 0 : i32
    %c0_i32_0 = arith.constant 0 : i32
    return %arg0, %c0_i32 : i32, i32
  }
}

</mosaic_0001>

<bundles_post_ra>
// kernel: dhead_forward.1
= control target key start
LH: loop header
LB: loop body
LE: loop exit
PB: predicated region body
PF: predicated region fallthrough
CT: control target
= control target key end

     0   :  { %vm140_vm0 = vcmask 7168   ;;  %s380_s2 = inlined_call_operand.vmem [shape: f32[256,1], index: 2, kind: input, shape index: {}]   ;;  %s381_s1 = inlined_call_operand.vmem [shape: f32[16,256], index: 1, kind: input, shape index: {}]   ;;  %s382_s0 = inlined_call_operand.<no memory space> [shape: f32[1,1], index: 0, kind: input, shape index: {}]   ;;  %s383_s3 = inlined_call_operand.vmem [shape: f32[16,1], index: 3, kind: output, shape index: {}]  }
   0x1   :  { %v35_v0 = vld [vmem:[%s380_s2 + $0x80] sm:$0xff]  ;;  %v36_v1 = vld [vmem:[%s380_s2 + $0x88] sm:$0xff]  ;;  %v37_v5 = vld [vmem:[%s380_s2 + $0x90] sm:$0xff]  ;;  %v52_v54 = vstv %s382_s0 }
   0x2   :  { %v19_v2 = vld [vmem:[%s380_s2] sm:$0xff]  ;;  %v187_v3 = vpack.c.bf16 %v36_v1, %v35_v0  ;;  %v20_v4 = vld [vmem:[%s380_s2 + $0x8] sm:$0xff]  ;;  %v38_v6 = vld [vmem:[%s380_s2 + $0x98] sm:$0xff] }
   0x3   :  { %v189_v7 = vpack.c.bf16 %v20_v4, %v19_v2  ;;  %v191_v8 = vpack.c.bf16 %v38_v6, %v37_v5  ;;  %v21_v9 = vld [vmem:[%s380_s2 + $0x10] sm:$0xff]  ;;  %v22_v10 = vld [vmem:[%s380_s2 + $0x18] sm:$0xff]  ;;  %v39_v11 = vld [vmem:[%s380_s2 + $0xa0] sm:$0xff] }
   0x4   :  { %188 = vmatprep.subr.bf16.mxu0 %v187_v3  ;;  %219 = vmatprep.subr.bf16.mxu1 %v187_v3  ;;  %v40_v12 = vld [vmem:[%s380_s2 + $0xa8] sm:$0xff]  ;;  %v193_v13 = vpack.c.bf16 %v22_v10, %v21_v9  ;;  %v23_v15 = vld [vmem:[%s380_s2 + $0x20] sm:$0xff]  ;;  %v41_v17 = vld [vmem:[%s380_s2 + $0xb0] sm:$0xff] }
   0x5   :  { %190 = vmatpush3.bf16.msra.mxu0 %v189_v7  ;;  %227 = vmatpush3.bf16.msra.mxu1 %v189_v7  ;;  %v195_v14 = vpack.c.bf16 %v40_v12, %v39_v11  ;;  %v24_v16 = vld [vmem:[%s380_s2 + $0x28] sm:$0xff]  ;;  %v42_v18 = vld [vmem:[%s380_s2 + $0xb8] sm:$0xff]  ;;  %v25_v21 = vld [vmem:[%s380_s2 + $0x30] sm:$0xff] }
   0x6   :  { %192 = vmatprep.subr.bf16.mxu0 %v191_v8  ;;  %220 = vmatprep.subr.bf16.mxu1 %v191_v8  ;;  %v197_v19 = vpack.c.bf16 %v24_v16, %v23_v15  ;;  %v199_v20 = vpack.c.bf16 %v42_v18, %v41_v17  ;;  %v26_v22 = vld [vmem:[%s380_s2 + $0x38] sm:$0xff]  ;;  %v43_v23 = vld [vmem:[%s380_s2 + $0xc0] sm:$0xff]  ;;  %v44_v24 = vld [vmem:[%s380_s2 + $0xc8] sm:$0xff] }
   0x7   :  { %v16_v25 = vld [vmem:[%s381_s1 + $0x8] sm:$0xff]  ;;  %v18_v26 = vld [vmem:[%s381_s1 + $0x18] sm:$0xff]  ;;  %v201_v27 = vpack.c.bf16 %v26_v22, %v25_v21  ;;  %v203_v28 = vpack.c.bf16 %v44_v24, %v43_v23  ;;  %v27_v29 = vld [vmem:[%s380_s2 + $0x40] sm:$0xff] }
   0x8   :  { %117 = vmatprep.mubr.f32.mxu0 %v16_v25  ;;  %v28_v30 = vld [vmem:[%s380_s2 + $0x48] sm:$0xff]  ;;  %v45_v31 = vld [vmem:[%s380_s2 + $0xd0] sm:$0xff]  ;;  %v46_v32 = vld [vmem:[%s380_s2 + $0xd8] sm:$0xff]  ;;  %122 = vmatprep.mubr.f32.mxu1 %v18_v26 }
   0x9   :  { %194 = vmatpush3.bf16.msra.mxu0 %v193_v13  ;;  %228 = vmatpush3.bf16.msra.mxu1 %v193_v13  ;;  %v205_v33 = vpack.c.bf16 %v28_v30, %v27_v29  ;;  %v207_v34 = vpack.c.bf16 %v46_v32, %v45_v31  ;;  %v29_v35 = vld [vmem:[%s380_s2 + $0x50] sm:$0xff]  ;;  %v30_v36 = vld [vmem:[%s380_s2 + $0x58] sm:$0xff]  ;;  %v47_v37 = vld [vmem:[%s380_s2 + $0xe0] sm:$0xff] }
   0xa   :  { %196 = vmatprep.subr.bf16.mxu0 %v195_v14  ;;  %221 = vmatprep.subr.bf16.mxu1 %v195_v14  ;;  %v48_v38 = vld [vmem:[%s380_s2 + $0xe8] sm:$0xff]  ;;  %v209_v39 = vpack.c.bf16 %v30_v36, %v29_v35  ;;  %v31_v41 = vld [vmem:[%s380_s2 + $0x60] sm:$0xff]  ;;  %v49_v43 = vld [vmem:[%s380_s2 + $0xf0] sm:$0xff] }
   0xb   :  { %v211_v40 = vpack.c.bf16 %v48_v38, %v47_v37  ;;  %v32_v42 = vld [vmem:[%s380_s2 + $0x68] sm:$0xff]  ;;  %v50_v44 = vld [vmem:[%s380_s2 + $0xf8] sm:$0xff]  ;;  %v33_v47 = vld [vmem:[%s380_s2 + $0x70] sm:$0xff] }
   0xc   :  { %v213_v45 = vpack.c.bf16 %v32_v42, %v31_v41  ;;  %v215_v46 = vpack.c.bf16 %v50_v44, %v49_v43  ;;  %v34_v48 = vld [vmem:[%s380_s2 + $0x78] sm:$0xff]  ;;  %v15_v50 = vld [vmem:[%s381_s1] sm:$0xff]  ;;  %v17_v51 = vld [vmem:[%s381_s1 + $0x10] sm:$0xff] }
   0xd   :  { %198 = vmatpush3.bf16.msra.mxu0 %v197_v19  ;;  %229 = vmatpush3.bf16.msra.mxu1 %v197_v19  ;;  %v217_v49 = vpack.c.bf16 %v34_v48, %v33_v47 }
   0xe   :  { %200 = vmatprep.subr.bf16.mxu0 %v199_v20  ;;  %222 = vmatprep.subr.bf16.mxu1 %v199_v20 }
  0x11   :  { %202 = vmatpush3.bf16.msra.mxu0 %v201_v27  ;;  %230 = vmatpush3.bf16.msra.mxu1 %v201_v27 }
  0x12   :  { %204 = vmatprep.subr.bf16.mxu0 %v203_v28  ;;  %223 = vmatprep.subr.bf16.mxu1 %v203_v28 }
  0x15   :  { %206 = vmatpush3.bf16.msra.mxu0 %v205_v33  ;;  %231 = vmatpush3.bf16.msra.mxu1 %v205_v33 }
  0x16   :  { %208 = vmatprep.subr.bf16.mxu0 %v207_v34  ;;  %224 = vmatprep.subr.bf16.mxu1 %v207_v34 }
  0x19   :  { %210 = vmatpush3.bf16.msra.mxu0 %v209_v39  ;;  %232 = vmatpush3.bf16.msra.mxu1 %v209_v39 }
  0x1a   :  { %212 = vmatprep.subr.bf16.mxu0 %v211_v40  ;;  %225 = vmatprep.subr.bf16.mxu1 %v211_v40 }
  0x1d   :  { %214 = vmatpush3.bf16.msra.mxu0 %v213_v45  ;;  %233 = vmatpush3.bf16.msra.mxu1 %v213_v45 }
  0x1e   :  { %216 = vmatprep.subr.bf16.mxu0 %v215_v46  ;;  %226 = vmatprep.subr.bf16.mxu1 %v215_v46 }
  0x21   :  { %218 = vmatpush3.bf16.msra.mxu0 %v217_v49  ;;  %234 = vmatpush3.bf16.msra.mxu1 %v217_v49 }
  0x24   :  { %118 = vmatmul.mubr.f32.vlgmr.msra.gmra.mrb[0].mxu0 %v15_v50  ;;  %123 = vmatmul.mubr.f32.vlgmr.msra.gmra.mrb[0].mxu1 %v17_v51 }
  0xf7   :  { %v181_v52 = vpop.f32.mrb[0].mxu0  ;;  %v184_v53 = vpop.f32.mrb[0].mxu1 }
  0xf8   :  { %v182_v55 = vpop.f32.mrb[1].mxu0  ;;  %v185_v56 = vpop.f32.mrb[1].mxu1 }
  0xf9   :  { %v183_v57 = vadd.f32 %v182_v55, %v181_v52  ;;  %v186_v58 = vadd.f32 %v185_v56, %v184_v53 }
  0xfb   :  { %v120_v59 = vadd.f32 %v183_v57, %v52_v54  ;;  %v125_v60 = vadd.f32 %v186_v58, %v52_v54 }
  0xfd   :  { %v147_v61 = vmul.f32 -1.442695, %v120_v59  ;;  %v148_v62 = vmul.f32 -1.442695, %v125_v60 }
  0xff   :  { %235 = vpow2.f32 %v147_v61 }
 0x100   :  { %237 = vpow2.f32 %v148_v62 }
 0x109   :  { %v236_v63 = vpop.eup %235 }
 0x10a   :  { %v238_v0 = vpop.eup %237  ;;  %v134_v1 = vadd.f32 1.0, %v236_v63 }
 0x10b   :  { %v135_v2 = vadd.f32 1.0, %v238_v0 }
 0x10c   :  { %239 = vrcp.f32 %v134_v1 }
 0x10d   :  { %241 = vrcp.f32 %v135_v2 }
 0x116   :  { %v240_v3 = vpop.eup %239 }
 0x117   :  { %v242_v4 = vpop.eup %241  ;;  %141 = vst.msk [vmem:[%s383_s3] sm:$0xff] %vm140_vm0, %v240_v3 }
 0x118   :  { %142 = vst.msk [vmem:[%s383_s3 + $0x8] sm:$0xff] %vm140_vm0, %v242_v4 }

</bundles_post_ra>
